<compile_context>
chip_gen: v5e
topology: v5e:2x2
jax: 0.10.0
libtpu: 0.0.40
codegen_flags: <defaults>
</compile_context>

<pallas_src>
import functools
import math

import jax
import jax.numpy as jnp
from jax.experimental import pallas as pl
from jax.experimental.pallas import tpu as pltpu

# Explicit VMEM budget: fits v7x's 64 MiB physical VMEM with headroom, and is
# harmless on v5e/v6e (128 MiB physical).
_VMEM_LIMIT = 48 * 1024 * 1024


# ----------------------------- helpers --------------------------------------
def _round_up(x, m):
    return ((x + m - 1) // m) * m


def _row_tile(m, tile_m):
    """Row tile (multiple of 8, capped at tile_m) and the padded row count."""
    tm = min(tile_m, _round_up(m, 8))
    return tm, _round_up(m, tm)


def _pad_rows(x2d, m_pad):
    m = x2d.shape[0]
    if m_pad == m:
        return x2d
    return jnp.pad(x2d, ((0, m_pad - m), (0, 0)))


# ------------------------ FFN (position-wise) kernel ------------------------
def _ffn_kernel(x_ref, w1_ref, b1_ref, w2_ref, b2_ref, o_ref, acc_ref):
    j = pl.program_id(1)

    @pl.when(j == 0)
    def _():
        acc_ref[...] = jnp.zeros_like(acc_ref)

    # First linear + bias + ReLU, kept in f32 (v5e-friendly: no bf16 VPU work).
    h = jnp.dot(x_ref[...], w1_ref[...], preferred_element_type=jnp.float32)
    h = jnp.maximum(h + b1_ref[...], 0.0)
    # dropout: identity (eval mode)
    # Downcast to the weight dtype only right before the second MXU matmul;
    # accumulation stays f32 in VMEM scratch.
    acc_ref[...] += jnp.dot(h.astype(w2_ref.dtype), w2_ref[...],
                            preferred_element_type=jnp.float32)

    @pl.when(j == pl.num_programs(1) - 1)
    def _():
        o_ref[...] = (acc_ref[...] + b2_ref[...]).astype(o_ref.dtype)


def _pick_ff_chunk(d_ff, tile_ff):
    # chunk must divide d_ff and be lane-friendly (multiple of 128) or full.
    for cand in (tile_ff, 512, 384, 256, 128):
        if 0 < cand <= d_ff and d_ff % cand == 0:
            return cand
    return d_ff


def feed_forward(x2d, w1, b1, w2, b2, *, tile_m=256, tile_ff=512):
    """y = relu(x @ w1 + b1) @ w2 + b2 over rows of x2d: [M, d_model]."""
    M, d_model = x2d.shape
    d_ff = w1.shape[1]
    tm, Mp = _row_tile(M, tile_m)
    tk = _pick_ff_chunk(d_ff, tile_ff)
    xp = _pad_rows(x2d, Mp)

    grid = (Mp // tm, d_ff // tk)
    itemsize = x2d.dtype.itemsize
    cost = pl.CostEstimate(
        flops=int(4 * Mp * d_model * d_ff),
        transcendentals=0,
        bytes_accessed=int((xp.size + w1.size + w2.size + b1.size + b2.size
                            + Mp * d_model) * itemsize),
    )

    out = pl.pallas_call(
        _ffn_kernel,
        out_shape=jax.ShapeDtypeStruct((Mp, d_model), x2d.dtype),
        grid_spec=pltpu.PrefetchScalarGridSpec(
            num_scalar_prefetch=0,
            grid=grid,
            in_specs=[
                pl.BlockSpec((tm, d_model), lambda i, j: (i, 0)),   # x tile
                pl.BlockSpec((d_model, tk), lambda i, j: (0, j)),   # W1 chunk (streamed)
                pl.BlockSpec((1, tk), lambda i, j: (0, j)),         # b1 chunk
                pl.BlockSpec((tk, d_model), lambda i, j: (j, 0)),   # W2 chunk (streamed)
                pl.BlockSpec((1, d_model), lambda i, j: (0, 0)),    # b2 (tiny)
            ],
            out_specs=pl.BlockSpec((tm, d_model), lambda i, j: (i, 0)),
            scratch_shapes=[pltpu.VMEM((tm, d_model), jnp.float32)],
        ),
        compiler_params=pltpu.CompilerParams(
            dimension_semantics=("parallel", "arbitrary"),
            vmem_limit_bytes=_VMEM_LIMIT),
        cost_estimate=cost,
    )(xp, w1, b1.reshape(1, d_ff), w2, b2.reshape(1, d_model))
    return out[:M]


# ---------------------------- Linear (x @ W + b) -----------------------------
def _linear_kernel(x_ref, w_ref, b_ref, o_ref):
    y = jnp.dot(x_ref[...], w_ref[...], preferred_element_type=jnp.float32)
    o_ref[...] = (y + b_ref[...]).astype(o_ref.dtype)


def linear(x2d, w, b, *, tile_m=256):
    M, K = x2d.shape
    N = w.shape[1]
    tm, Mp = _row_tile(M, tile_m)
    xp = _pad_rows(x2d, Mp)
    out = pl.pallas_call(
        _linear_kernel,
        out_shape=jax.ShapeDtypeStruct((Mp, N), x2d.dtype),
        grid_spec=pltpu.PrefetchScalarGridSpec(
            num_scalar_prefetch=0,
            grid=(Mp // tm,),
            in_specs=[
                pl.BlockSpec((tm, K), lambda i: (i, 0)),
                pl.BlockSpec((K, N), lambda i: (0, 0)),
                pl.BlockSpec((1, N), lambda i: (0, 0)),
            ],
            out_specs=pl.BlockSpec((tm, N), lambda i: (i, 0)),
        ),
        compiler_params=pltpu.CompilerParams(
            dimension_semantics=("parallel",),
            vmem_limit_bytes=_VMEM_LIMIT),
    )(xp, w, b.reshape(1, N))
    return out[:M]


# -------------------------- Scaled dot-product attention --------------------
def _attention_kernel(q_ref, k_ref, v_ref, m_ref, o_ref):
    scale = 1.0 / math.sqrt(q_ref.shape[-1])
    s = jnp.einsum('bqd,bkd->bqk', q_ref[...], k_ref[...],
                   preferred_element_type=jnp.float32) * scale
    # spec: scores.masked_fill(mask == 0, -1e-09)
    s = jnp.where(m_ref[...] == 0, jnp.float32(-1e-09), s)
    s = s - jnp.max(s, axis=-1, keepdims=True)
    p = jnp.exp(s)
    p = p / jnp.sum(p, axis=-1, keepdims=True)
    # dropout on attention probabilities: identity (eval mode)
    o = jnp.einsum('bqk,bkd->bqd', p.astype(v_ref.dtype), v_ref[...],
                   preferred_element_type=jnp.float32)
    o_ref[...] = o.astype(o_ref.dtype)


def attention(q, k, v, mask):
    """q: [BH, Tq, dk], k/v: [BH, Tk, dk], mask: [BH, Tq, Tk] (0 => masked)."""
    BH, Tq, dk = q.shape
    Tk = k.shape[1]
    return pl.pallas_call(
        _attention_kernel,
        out_shape=jax.ShapeDtypeStruct((BH, Tq, dk), q.dtype),
        grid_spec=pltpu.PrefetchScalarGridSpec(
            num_scalar_prefetch=0,
            grid=(BH,),
            in_specs=[
                pl.BlockSpec((1, Tq, dk), lambda b: (b, 0, 0)),
                pl.BlockSpec((1, Tk, dk), lambda b: (b, 0, 0)),
                pl.BlockSpec((1, Tk, dk), lambda b: (b, 0, 0)),
                pl.BlockSpec((1, Tq, Tk), lambda b: (b, 0, 0)),
            ],
            out_specs=pl.BlockSpec((1, Tq, dk), lambda b: (b, 0, 0)),
        ),
        compiler_params=pltpu.CompilerParams(
            dimension_semantics=("parallel",),
            vmem_limit_bytes=_VMEM_LIMIT),
    )(q, k, v, mask)


# ----------------------- Residual + LayerNorm (fused) ------------------------
def _add_norm_kernel(y_ref, r_ref, a_ref, b_ref, o_ref, *, eps):
    y = y_ref[...].astype(jnp.float32)
    d = y.shape[-1]
    mean = jnp.mean(y, axis=-1, keepdims=True)
    c = y - mean
    # torch.std defaults to the unbiased (n - 1) estimator.
    std = jnp.sqrt(jnp.sum(c * c, axis=-1, keepdims=True) / jnp.float32(d - 1))
    n = a_ref[...] * c / (std + eps) + b_ref[...]
    o_ref[...] = (r_ref[...].astype(jnp.float32) + n).astype(o_ref.dtype)


def add_norm(y, residual, a, b, *, eps=1e-6, tile_m=256):
    """residual + LayerNorm(y) with the spec's a*(y-mean)/(std+eps)+b."""
    shape = y.shape
    D = shape[-1]
    y2 = y.reshape(-1, D)
    r2 = residual.reshape(-1, D)
    M = y2.shape[0]
    tm, Mp = _row_tile(M, tile_m)
    y2 = _pad_rows(y2, Mp)
    r2 = _pad_rows(r2, Mp)
    out = pl.pallas_call(
        functools.partial(_add_norm_kernel, eps=eps),
        out_shape=jax.ShapeDtypeStruct((Mp, D), y.dtype),
        grid_spec=pltpu.PrefetchScalarGridSpec(
            num_scalar_prefetch=0,
            grid=(Mp // tm,),
            in_specs=[
                pl.BlockSpec((tm, D), lambda i: (i, 0)),
                pl.BlockSpec((tm, D), lambda i: (i, 0)),
                pl.BlockSpec((1, D), lambda i: (0, 0)),
                pl.BlockSpec((1, D), lambda i: (0, 0)),
            ],
            out_specs=pl.BlockSpec((tm, D), lambda i: (i, 0)),
        ),
        compiler_params=pltpu.CompilerParams(
            dimension_semantics=("parallel",),
            vmem_limit_bytes=_VMEM_LIMIT),
    )(y2, r2, a.reshape(1, D), b.reshape(1, D))
    return out[:M].reshape(shape)


def layer_norm(x, a, b, *, eps=1e-6):
    return add_norm(x, jnp.zeros_like(x), a, b, eps=eps)


# --------------------------- Module-level wrappers ---------------------------
def multi_head_attention(p, q_in, k_in, v_in, mask, head):
    B, Tq, D = q_in.shape
    Tk = k_in.shape[1]
    d_k = D // head

    def project(x, w, bias, t):
        y = linear(x.reshape(-1, D), w, bias)
        return (y.reshape(B, t, head, d_k)
                 .transpose(0, 2, 1, 3)
                 .reshape(B * head, t, d_k))

    q = project(q_in, p['wq'], p['bq'], Tq)
    k = project(k_in, p['wk'], p['bk'], Tk)
    v = project(v_in, p['wv'], p['bv'], Tk)

    # mask.unsqueeze(1) in the spec -> broadcast across heads
    mask_bh = jnp.broadcast_to(mask[:, None, :, :].astype(jnp.float32),
                               (B, head, Tq, Tk)).reshape(B * head, Tq, Tk)
    o = attention(q, k, v, mask_bh)
    o = o.reshape(B, head, Tq, d_k).transpose(0, 2, 1, 3).reshape(B * Tq, D)
    return linear(o, p['wo'], p['bo']).reshape(B, Tq, D)


def decoder_forward(params, x, memory, source_mask, target_mask, head):
    B, T, D = x.shape
    for lp in params['layers']:
        y = multi_head_attention(lp['self_attn'], x, x, x, target_mask, head)
        x = add_norm(y, x, lp['ln_a'][0], lp['ln_b'][0])
        y = multi_head_attention(lp['src_attn'], x, memory, memory, source_mask, head)
        x = add_norm(y, x, lp['ln_a'][1], lp['ln_b'][1])
        f = lp['ffn']
        y = feed_forward(x.reshape(-1, D), f['w1'], f['b1'],
                         f['w2'], f['b2']).reshape(B, T, D)
        x = add_norm(y, x, lp['ln_a'][2], lp['ln_b'][2])
    return layer_norm(x, params['final_a'], params['final_b'])


# --------------------------------- Init --------------------------------------
def _init_linear(key, d_in, d_out, dtype):
    kw, kb = jax.random.split(key)
    bound = 1.0 / math.sqrt(d_in)
    w = jax.random.uniform(kw, (d_in, d_out), dtype, -bound, bound)  # stored as [in, out]
    b = jax.random.uniform(kb, (d_out,), dtype, -bound, bound)
    return w, b


def _init_mha(key, d_model, dtype):
    ks = jax.random.split(key, 4)
    wq, bq = _init_linear(ks[0], d_model, d_model, dtype)
    wk, bk = _init_linear(ks[1], d_model, d_model, dtype)
    wv, bv = _init_linear(ks[2], d_model, d_model, dtype)
    wo, bo = _init_linear(ks[3], d_model, d_model, dtype)
    return dict(wq=wq, bq=bq, wk=wk, bk=bk, wv=wv, bv=bv, wo=wo, bo=bo)


def _init_ffn(key, d_model, d_ff, dtype):
    k1, k2 = jax.random.split(key)
    w1, b1 = _init_linear(k1, d_model, d_ff, dtype)
    w2, b2 = _init_linear(k2, d_ff, d_model, dtype)
    return dict(w1=w1, b1=b1, w2=w2, b2=b2)


def init_decoder_params(key, n_layers, d_model, d_ff, dtype=jnp.float32):
    layers = []
    keys = jax.random.split(key, n_layers)
    for i in range(n_layers):
        ks = jax.random.split(keys[i], 3)
        layers.append(dict(
            self_attn=_init_mha(ks[0], d_model, dtype),
            src_attn=_init_mha(ks[1], d_model, dtype),
            ffn=_init_ffn(ks[2], d_model, d_ff, dtype),
            ln_a=[jnp.ones((d_model,), dtype) for _ in range(3)],
            ln_b=[jnp.zeros((d_model,), dtype) for _ in range(3)],
        ))
    return dict(layers=layers,
                final_a=jnp.ones((d_model,), dtype),
                final_b=jnp.zeros((d_model,), dtype))


# ------------------------------ Pure-JAX reference ---------------------------
def _ref_linear(x, w, b):
    return jnp.einsum('...d,df->...f', x, w,
                      precision=jax.lax.Precision.HIGHEST) + b


def _ref_norm(x, a, b, eps=1e-6):
    mean = jnp.mean(x, axis=-1, keepdims=True)
    std = jnp.std(x, axis=-1, keepdims=True, ddof=1)
    return a * (x - mean) / (std + eps) + b


def _ref_mha(p, q_in, k_in, v_in, mask, head):
    B, Tq, D = q_in.shape
    Tk = k_in.shape[1]
    d_k = D // head

    def split(y, t):
        return y.reshape(B, t, head, d_k).transpose(0, 2, 1, 3)

    q = split(_ref_linear(q_in, p['wq'], p['bq']), Tq)
    k = split(_ref_linear(k_in, p['wk'], p['bk']), Tk)
    v = split(_ref_linear(v_in, p['wv'], p['bv']), Tk)
    s = jnp.einsum('bhqd,bhkd->bhqk', q, k,
                   precision=jax.lax.Precision.HIGHEST) / math.sqrt(d_k)
    s = jnp.where(mask[:, None, :, :] == 0, -1e-09, s)
    att = jax.nn.softmax(s, axis=-1)
    o = jnp.einsum('bhqk,bhkd->bhqd', att, v,
                   precision=jax.lax.Precision.HIGHEST)
    o = o.transpose(0, 2, 1, 3).reshape(B, Tq, D)
    return _ref_linear(o, p['wo'], p['bo'])


def _ref_ffn(p, x):
    h = jnp.maximum(_ref_linear(x, p['w1'], p['b1']), 0.0)
    return _ref_linear(h, p['w2'], p['b2'])


def decoder_reference(params, x, memory, source_mask, target_mask, head):
    for lp in params['layers']:
        x = x + _ref_norm(_ref_mha(lp['self_attn'], x, x, x, target_mask, head),
                          lp['ln_a'][0], lp['ln_b'][0])
        x = x + _ref_norm(_ref_mha(lp['src_attn'], x, memory, memory, source_mask, head),
                          lp['ln_a'][1], lp['ln_b'][1])
        x = x + _ref_norm(_ref_ffn(lp['ffn'], x), lp['ln_a'][2], lp['ln_b'][2])
    return _ref_norm(x, params['final_a'], params['final_b'])


# ----------------------------------- Main ------------------------------------
if __name__ == "__main__":
    # Small but lane-dense shapes: d_model is a multiple of 128 so output stores
    # are unmasked (per perf feedback); target seq 8, source seq 16, 2 layers.
    B, T, S = 2, 8, 16
    d_model, d_ff, head, n_layers = 128, 512, 4, 2

    key = jax.random.PRNGKey(0)
    kx, km, kp = jax.random.split(key, 3)
    x = jax.random.normal(kx, (B, T, d_model), jnp.float32)
    memory = jax.random.normal(km, (B, S, d_model), jnp.float32)
    target_mask = jnp.broadcast_to(jnp.tril(jnp.ones((T, T), jnp.float32)), (B, T, T))
    source_mask = jnp.ones((B, T, S), jnp.float32)

    params = init_decoder_params(kp, n_layers, d_model, d_ff)

    y = decoder_forward(params, x, memory, source_mask, target_mask, head)
    jax.block_until_ready(y)

    y_ref = decoder_reference(params, x, memory, source_mask, target_mask, head)
    assert y.shape == (B, T, d_model)
    max_diff = float(jnp.max(jnp.abs(y - y_ref)))
    assert jnp.allclose(y, y_ref, atol=2e-3, rtol=2e-3), (
        "mismatch vs reference, max abs diff = %g" % max_diff)

    print("KERNEL_OK")
</pallas_src>

<mosaic_0001>
module attributes {stable_mosaic.version = 11 : i64} {
  func.func @_linear_kernel(%arg0: i32, %arg1: memref<16x128xf32, #tpu.memory_space<vmem>>, %arg2: memref<128x128xf32, #tpu.memory_space<vmem>>, %arg3: memref<1x128xf32, #tpu.memory_space<vmem>>, %arg4: memref<16x128xf32, #tpu.memory_space<vmem>>) attributes {dimension_semantics = [#tpu.dimension_semantics<parallel>], iteration_bounds = array<i64: 1>, scalar_prefetch = 0 : i64, scratch_operands = 0 : i64, tpu.core_type = #tpu.core_type<tc>, window_params = [{transform_indices = @transform_0, window_bounds = array<i64: 16, 128>}, {pipeline_mode = #tpu.pipeline_mode<synchronous>, transform_indices = @transform_1, window_bounds = array<i64: 128, 128>}, {pipeline_mode = #tpu.pipeline_mode<synchronous>, transform_indices = @transform_2, window_bounds = array<i64: 1, 128>}, {transform_indices = @transform_3, window_bounds = array<i64: 16, 128>}]} {
    %c0 = arith.constant 0 : index
    %c0_0 = arith.constant 0 : index
    %0 = vector.load %arg1[%c0, %c0_0] : memref<16x128xf32, #tpu.memory_space<vmem>>, vector<16x128xf32>
    %c0_1 = arith.constant 0 : index
    %c0_2 = arith.constant 0 : index
    %1 = vector.load %arg2[%c0_1, %c0_2] : memref<128x128xf32, #tpu.memory_space<vmem>>, vector<128x128xf32>
    %cst = arith.constant dense<0.000000e+00> : vector<16x128xf32>
    %2 = tpu.matmul %0, %1, %cst {dimension_numbers = #tpu.dot_dimension_numbers<[1], [0], [0], [1], [0, 0, 1, 1], [], []>} : vector<16x128xf32>, vector<128x128xf32>, vector<16x128xf32> -> vector<16x128xf32>
    %c0_3 = arith.constant 0 : index
    %c0_4 = arith.constant 0 : index
    %3 = vector.load %arg3[%c0_3, %c0_4] : memref<1x128xf32, #tpu.memory_space<vmem>>, vector<1x128xf32>
    %4 = vector.broadcast %3 : vector<1x128xf32> to vector<16x128xf32>
    %5 = arith.addf %2, %4 : vector<16x128xf32>
    %c0_5 = arith.constant 0 : index
    %c0_6 = arith.constant 0 : index
    %6 = vector.load %arg4[%c0_5, %c0_6] : memref<16x128xf32, #tpu.memory_space<vmem>>, vector<16x128xf32>
    tpu.vector_store %arg4[%c0_5, %c0_6], %5 {strides = array<i32>} : memref<16x128xf32, #tpu.memory_space<vmem>>, vector<16x128xf32>,
    return
  }
  func.func @transform_0(%arg0: i32) -> (i32, i32) {
    %c0_i32 = arith.constant 0 : i32
    %c0_i32_0 = arith.constant 0 : i32
    return %arg0, %c0_i32 : i32, i32
  }
  func.func @transform_1(%arg0: i32) -> (i32, i32) {
    %c0_i32 = arith.constant 0 : i32
    %c0_i32_0 = arith.constant 0 : i32
    %c0_i32_1 = arith.constant 0 : i32
    return %c0_i32, %c0_i32_0 : i32, i32
  }
  func.func @transform_2(%arg0: i32) -> (i32, i32) {
    %c0_i32 = arith.constant 0 : i32
    %c0_i32_0 = arith.constant 0 : i32
    %c0_i32_1 = arith.constant 0 : i32
    return %c0_i32, %c0_i32_0 : i32, i32
  }
  func.func @transform_3(%arg0: i32) -> (i32, i32) {
    %c0_i32 = arith.constant 0 : i32
    %c0_i32_0 = arith.constant 0 : i32
    return %arg0, %c0_i32 : i32, i32
  }
}

</mosaic_0001>

<bundles_post_ra>
// kernel: tpu_custom_call.1
= control target key start
LH: loop header
LB: loop body
LE: loop exit
PB: predicated region body
PF: predicated region fallthrough
CT: control target
= control target key end

     0   :  { %8 = vsyncpa [#allocation3], 0  ;;  %s260_s0 = inlined_call_operand.hbm [shape: f32[16,128], index: 0, kind: input, shape index: {}]   ;;  %s261_s1 = inlined_call_operand.hbm [shape: f32[128,128], index: 1, kind: input, shape index: {}]   ;;  %s262_s2 = inlined_call_operand.vmem [shape: f32[1,128], index: 2, kind: input, shape index: {}]   ;;  %s263_s3 = inlined_call_operand.hbm [shape: f32[16,128], index: 3, kind: output, shape index: {}]  }
   0x1   :  { %9 = vsyncpa [#allocation6], 0 }
   0x2   :  { %10 = vsyncpa [#allocation4], 0  ;;  %s15_s14 = sshll.u32 %s260_s0, 4  ;;  %s214_s15 = smov [#allocation2]   ;;  %s16_s14 = int_to_ptr.hbm [resolvable:$true] %s15_s14 }
   0x3   :  { %s17_s16 = sshll.u32 %s214_s15, 4  ;;  %s28_s19 = sshll.u32 %s261_s1, 4  ;;  %s18_s16 = int_to_ptr.vmem [resolvable:$true] %s17_s16  ;;  %s29_s19 = int_to_ptr.hbm [resolvable:$true] %s28_s19 }
   0x4   :  { %s215_s20 = smov 128   ;;  %s216_s21 = smov 8  }
   0x5   :  { %23 = dma.hbm_to_vmem [thread:$0]  %s16_s14, 256, %s18_s16, [#allocation3], %s215_s20, %s215_s20, %s216_s21  }
   0x6   :  { %s217_s22 = smov [#allocation5]  }
   0x7   :  { %s30_s23 = sshll.u32 %s217_s22, 4  ;;  %s31_s23 = int_to_ptr.vmem [resolvable:$true] %s30_s23 }
   0x8   :  { %36 = dma.hbm_to_vmem [thread:$0]  %s29_s19, 2048, %s31_s23, [#allocation6], %s215_s20, %s215_s20, %s216_s21  }
   0x9   :  { %208 = dma.done.wait [#allocation3], 256  }
   0xa   :  { %209 = vsyncadd [#allocation3], 4294967040 }
   0xb   :  { %210 = dma.done.wait [#allocation6], 2048  }
   0xc   :  { %211 = vsyncadd [#allocation6], 4294965248  ;;  %v64_v0 = vld [vmem:[#allocation5 + $0x78] sm:$0xff]  ;;  %v63_v1 = vld [vmem:[#allocation5 + $0x70] sm:$0xff]  ;;  %s218_s24 = smov [#allocation7]   ;;  %s100_s28 = sshll.u32 %s263_s3, 4  ;;  %s101_s28 = int_to_ptr.hbm [resolvable:$true] %s100_s28 }
   0xd   :  { %69 = vmatpush.msra.mxu0 %v64_v0  ;;  %114 = vmatpush.msra.mxu1 %v64_v0  ;;  %v62_v2 = vld [vmem:[#allocation5 + $0x68] sm:$0xff]  ;;  %v61_v3 = vld [vmem:[#allocation5 + $0x60] sm:$0xff]  ;;  %v60_v4 = vld [vmem:[#allocation5 + $0x58] sm:$0xff]  ;;  %s98_s25 = sshll.u32 %s218_s24, 4  ;;  %s99_s25 = int_to_ptr.vmem [resolvable:$true] %s98_s25 }
   0xe   :  { %v59_v5 = vld [vmem:[#allocation5 + $0x50] sm:$0xff]  ;;  %v58_v6 = vld [vmem:[#allocation5 + $0x48] sm:$0xff]  ;;  %v57_v7 = vld [vmem:[#allocation5 + $0x40] sm:$0xff] }
   0xf   :  { %70 = vmatpush.msra.mxu0 %v63_v1  ;;  %115 = vmatpush.msra.mxu1 %v63_v1  ;;  %v56_v8 = vld [vmem:[#allocation5 + $0x38] sm:$0xff]  ;;  %v55_v9 = vld [vmem:[#allocation5 + $0x30] sm:$0xff]  ;;  %v54_v10 = vld [vmem:[#allocation5 + $0x28] sm:$0xff] }
  0x10   :  { %v53_v11 = vld [vmem:[#allocation5 + $0x20] sm:$0xff]  ;;  %v52_v12 = vld [vmem:[#allocation5 + $0x18] sm:$0xff]  ;;  %v51_v13 = vld [vmem:[#allocation5 + $0x10] sm:$0xff] }
  0x11   :  { %71 = vmatpush.msra.mxu0 %v62_v2  ;;  %116 = vmatpush.msra.mxu1 %v62_v2  ;;  %v50_v14 = vld [vmem:[#allocation5 + $0x8] sm:$0xff]  ;;  %v49_v15 = vld [vmem:[#allocation5] sm:$0xff]  ;;  %v47_v16 = vld [vmem:[#allocation2] sm:$0xff] }
  0x12   :  { %v48_v17 = vld [vmem:[#allocation2 + $0x8] sm:$0xff]  ;;  %v135_v18 = vld [vmem:[%s262_s2] ss:$0 sm:$0xff] }
  0x13   :  { %72 = vmatpush.msra.mxu0 %v61_v3  ;;  %117 = vmatpush.msra.mxu1 %v61_v3 }
  0x15   :  { %73 = vmatpush.msra.mxu0 %v60_v4  ;;  %118 = vmatpush.msra.mxu1 %v60_v4 }
  0x17   :  { %74 = vmatpush.msra.mxu0 %v59_v5  ;;  %119 = vmatpush.msra.mxu1 %v59_v5 }
  0x19   :  { %75 = vmatpush.msra.mxu0 %v58_v6  ;;  %120 = vmatpush.msra.mxu1 %v58_v6 }
  0x1b   :  { %76 = vmatpush.msra.mxu0 %v57_v7  ;;  %121 = vmatpush.msra.mxu1 %v57_v7 }
  0x1d   :  { %77 = vmatpush.msra.mxu0 %v56_v8  ;;  %122 = vmatpush.msra.mxu1 %v56_v8 }
  0x1f   :  { %78 = vmatpush.msra.mxu0 %v55_v9  ;;  %123 = vmatpush.msra.mxu1 %v55_v9 }
  0x21   :  { %79 = vmatpush.msra.mxu0 %v54_v10  ;;  %124 = vmatpush.msra.mxu1 %v54_v10 }
  0x23   :  { %80 = vmatpush.msra.mxu0 %v53_v11  ;;  %125 = vmatpush.msra.mxu1 %v53_v11 }
  0x25   :  { %81 = vmatpush.msra.mxu0 %v52_v12  ;;  %126 = vmatpush.msra.mxu1 %v52_v12 }
  0x27   :  { %82 = vmatpush.msra.mxu0 %v51_v13  ;;  %127 = vmatpush.msra.mxu1 %v51_v13 }
  0x29   :  { %83 = vmatpush.msra.mxu0 %v50_v14  ;;  %128 = vmatpush.msra.mxu1 %v50_v14 }
  0x2b   :  { %84 = vmatpush.msra.mxu0 %v49_v15  ;;  %129 = vmatpush.msra.mxu1 %v49_v15 }
  0x2c   :  { %85 = vmatmul.f32.vlgmr.msra.gmra.mxu0 %v47_v16  ;;  %88 = vmatmul.f32.vlgmr.msra.gmra.mxu1 %v48_v17 }
  0xa9   :  { %v86_v19 = vpop.f32.mrf.mxu0  ;;  %v89_v20 = vpop.f32.mrf.mxu1 }
  0xaa   :  { %v87_v21 = vadd.f32 %v135_v18, %v86_v19  ;;  %v90_v22 = vadd.f32 %v135_v18, %v89_v20 }
  0xac   :  { %92 = vst [vmem:[#allocation7] sm:$0xff] %v87_v21 }
  0xad   :  { %93 = vst [vmem:[#allocation7 + $0x8] sm:$0xff] %v90_v22 }
  0xae   :  { %106 = dma.vmem_to_hbm [thread:$0]  %s99_s25, 256, %s101_s28, [#allocation4], %s215_s20, %s215_s20, %s216_s21  }
  0xaf   :  { %212 = dma.done.wait [#allocation4], 256  }
  0xb0   :  { %213 = vsyncadd [#allocation4], 4294967040 }
  0xb1   :  { %111 = vsyncpa [#allocation3], 1 }
  0xb2   :  { %112 = vsyncpa [#allocation6], 1 }
  0xb3   :  { %113 = vsyncpa [#allocation4], 1 }

</bundles_post_ra>
